<compile_context>
chip_gen: v6e
topology: v6e:2x2x1
jax: 0.10.0
libtpu: 0.0.40
codegen_flags: <defaults>
</compile_context>

<pallas_src>
import functools

import jax
import jax.numpy as jnp
from jax.experimental import pallas as pl
from jax.experimental.pallas import tpu as pltpu

LANES = 128      # vreg lane count -> batch tile granularity (minor axis)
SUBLANES = 8     # f32 sublane count -> action-axis padding granularity
NEG_BIG = -1e30  # bias for padded action rows: exp(NEG_BIG - m) == 0.0 in f32


def _round_up(n: int, m: int) -> int:
    return (n + m - 1) // m * m


def _policy_kernel(xt_ref, p_ref, out_ref, *, s_pad, hidden, a_pad):
    """probs^T = softmax(W2^T @ relu(W1^T @ x^T + b1) + b2) on one batch tile.

    Everything is action/hidden-major: the batch is the lane (minor) axis, so
    both the streamed x^T tiles and the (a_pad, tile_b) output stores are
    lane-dense.  Parameters arrive packed in a single VMEM-resident buffer
    `p_ref` (see pack_policy_params for the layout); padded action rows carry
    b2 = NEG_BIG so they vanish from the softmax.
    """
    xt = xt_ref[...]                                             # [s_pad, tb]
    w1t = p_ref[:hidden, :s_pad]                                 # [H, s_pad]
    b1 = p_ref[:hidden, s_pad:s_pad + 1].astype(jnp.float32)     # [H, 1]
    b2 = p_ref[:a_pad, s_pad + 1:s_pad + 2].astype(jnp.float32)  # [A8, 1]
    w2t = p_ref[hidden:hidden + a_pad, :hidden]                  # [A8, H]

    # lin1 on the MXU, f32 accumulation; bias broadcast along lanes (batch).
    h = jnp.dot(w1t, xt, preferred_element_type=jnp.float32)     # [H, tb]
    h = h + b1

    # Dropout (p=0.6) is identity in eval mode, matching model.eval().
    # TODO(synk): train-mode dropout would use pltpu.prng_seed/prng_random_bits.
    h = jnp.maximum(h, 0.0)

    # lin2 on the MXU; in the bf16 path only the fresh activation h is cast.
    logits = jnp.dot(w2t, h.astype(xt.dtype),
                     preferred_element_type=jnp.float32)         # [A8, tb]
    logits = logits + b2                                         # pad rows -> NEG_BIG

    # Numerically stable softmax over the action (sublane) axis, all in f32.
    m = jnp.max(logits, axis=0, keepdims=True)                   # [1, tb]
    e = jnp.exp(logits - m)                                      # pad rows -> 0.0
    denom = jnp.sum(e, axis=0, keepdims=True)                    # [1, tb]
    # Exact divide (not pl.reciprocal(approx=True)): keeps row sums == 1 to ulp.
    out_ref[...] = (e / denom).astype(out_ref.dtype)


def pack_policy_params(w1, b1, w2, b2, *, dtype=jnp.float32):
    """Pack (W1[S,H], b1[*,H], W2[H,A], b2[*,A]) into one lane-dense buffer.

    Layout (rows x lanes), all section starts 8/16-row aligned:
      [0:H ,      0:s_pad ]  W1^T  ([H, S], zero-padded cols S..s_pad)
      [0:H ,      s_pad   ]  b1    (column)
      [0:A8,      s_pad+1 ]  b2    (column; padded action rows = NEG_BIG)
      [H:H+A8,    0:H     ]  W2^T  ([A8, H], padded action rows = 0)
    """
    S, H = w1.shape
    H2, A = w2.shape
    assert H2 == H
    s_pad = _round_up(S, SUBLANES)
    a_pad = _round_up(A, SUBLANES)
    width = _round_up(max(s_pad + 2, H), LANES)
    rows = _round_up(H + a_pad, 2 * SUBLANES)   # 16-row aligned (bf16 friendly)

    params = jnp.zeros((rows, width), jnp.float32)
    params = params.at[:H, :S].set(jnp.asarray(w1, jnp.float32).T)
    params = params.at[:H, s_pad].set(jnp.reshape(b1, (-1,)).astype(jnp.float32))
    b2_col = jnp.full((a_pad,), NEG_BIG, jnp.float32)
    b2_col = b2_col.at[:A].set(jnp.reshape(b2, (-1,)).astype(jnp.float32))
    params = params.at[:a_pad, s_pad + 1].set(b2_col)
    params = params.at[H:H + A, :H].set(jnp.asarray(w2, jnp.float32).T)
    # Hoisted cast: bf16 path packs bf16 weights once instead of re-casting the
    # VMEM-resident weights on every grid step.
    params = params.astype(dtype)

    meta = dict(S=S, H=H, A=A, s_pad=s_pad, a_pad=a_pad,
                rows=rows, width=width)
    return params, meta


def policy_forward(x, w1, b1, w2, b2, *, tile_b=1024, use_bf16_matmul=False):
    """softmax(relu(dropout(x @ W1 + b1)) @ W2 + b2, dim=1); dropout in eval mode."""
    B, S = x.shape
    compute_dtype = jnp.bfloat16 if use_bf16_matmul else jnp.float32
    params, meta = pack_policy_params(w1, b1, w2, b2, dtype=compute_dtype)
    H, A = meta["H"], meta["A"]
    s_pad, a_pad = meta["s_pad"], meta["a_pad"]

    # Batch lives on the 128-lane axis of every block, so the batch tile must
    # be a multiple of 128.  Cap it at ceil(B/2) so the grid has >=2 steps
    # whenever possible -> dimension_semantics=("parallel",) can split the
    # batch across v7x's two TensorCores (no effect on v5e/v6e).
    half_b = _round_up(pl.cdiv(B, 2), LANES)
    tb = max(LANES, min(_round_up(tile_b, LANES), half_b))
    b_pad = _round_up(B, tb)

    # Build x^T once in the compute dtype (pad + transpose fuse into one XLA
    # op); this is the price for the ~16x smaller action-major output writeback.
    x_t = jnp.zeros((s_pad, b_pad), compute_dtype).at[:S, :B].set(
        x.astype(compute_dtype).T)

    kernel = functools.partial(_policy_kernel, s_pad=s_pad, hidden=H,
                               a_pad=a_pad)

    grid_spec = pltpu.PrefetchScalarGridSpec(
        num_scalar_prefetch=0,
        grid=(b_pad // tb,),
        in_specs=[
            # Streamed batch tiles of x^T (auto double-buffered).
            pl.BlockSpec((s_pad, tb), lambda i: (0, i)),
            # Single packed parameter buffer, VMEM-resident across the grid.
            pl.BlockSpec((meta["rows"], meta["width"]), lambda i: (0, 0)),
        ],
        out_specs=pl.BlockSpec((a_pad, tb), lambda i: (0, i)),
    )

    itemsize = jnp.dtype(compute_dtype).itemsize
    cost = pl.CostEstimate(
        flops=2 * b_pad * H * (s_pad + a_pad) + 6 * b_pad * a_pad,
        transcendentals=b_pad * a_pad,
        bytes_accessed=(x_t.size * itemsize + params.size * itemsize
                        + a_pad * b_pad * 4),
    )

    out_t = pl.pallas_call(
        kernel,
        out_shape=jax.ShapeDtypeStruct((a_pad, b_pad), jnp.float32),
        grid_spec=grid_spec,
        compiler_params=pltpu.CompilerParams(
            dimension_semantics=("parallel",)),   # megacore batch split on v7x
        cost_estimate=cost,
    )(x_t, params)

    # Back to the PyTorch (batch, actions) orientation; padded rows/cols dropped.
    return out_t[:A, :B].T


def init_policy_params(key, state_dim, action_dim, hidden_dim=128):
    """Deterministic init mimicking nn.Linear default (U[-1/sqrt(fan_in), ...])."""
    k1, k2, k3, k4 = jax.random.split(key, 4)
    bound1 = 1.0 / jnp.sqrt(state_dim)
    bound2 = 1.0 / jnp.sqrt(hidden_dim)
    # Stored transposed relative to PyTorch so the math is x @ W + b.
    w1 = jax.random.uniform(k1, (state_dim, hidden_dim), jnp.float32, -bound1, bound1)
    b1 = jax.random.uniform(k2, (1, hidden_dim), jnp.float32, -bound1, bound1)
    w2 = jax.random.uniform(k3, (hidden_dim, action_dim), jnp.float32, -bound2, bound2)
    b2 = jax.random.uniform(k4, (1, action_dim), jnp.float32, -bound2, bound2)
    return w1, b1, w2, b2


if __name__ == "__main__":
    state_dim = 16
    action_dim = 4
    batch = 8

    key = jax.random.PRNGKey(0)
    kx, kp = jax.random.split(key)

    x = jax.random.normal(kx, (batch, state_dim), jnp.float32)
    w1, b1, w2, b2 = init_policy_params(kp, state_dim, action_dim)

    # Pure-JAX reference (dropout identity in eval mode).
    h_ref = jnp.maximum(x @ w1 + b1, 0.0)
    ref = jax.nn.softmax(h_ref @ w2 + b2, axis=1)

    # f32 MXU path.
    fwd = jax.jit(functools.partial(policy_forward, use_bf16_matmul=False))
    probs = jax.block_until_ready(fwd(x, w1, b1, w2, b2))

    assert probs.shape == (batch, action_dim)
    # Exact divide in the kernel -> row sums are 1.0 to float rounding.
    assert bool(jnp.allclose(jnp.sum(probs, axis=1), 1.0, atol=1e-4))
    # Tolerance covers MXU default-precision matmuls vs. the XLA reference.
    assert bool(jnp.allclose(probs, ref, atol=2e-2))

    # bf16-packed MXU path (weights packed bf16 once, x streamed bf16).
    fwd_bf16 = jax.jit(functools.partial(policy_forward, use_bf16_matmul=True))
    probs_bf16 = jax.block_until_ready(fwd_bf16(x, w1, b1, w2, b2))
    assert probs_bf16.shape == (batch, action_dim)
    assert bool(jnp.allclose(jnp.sum(probs_bf16, axis=1), 1.0, atol=1e-4))
    assert bool(jnp.allclose(probs_bf16, ref, atol=5e-2))

    print("KERNEL_OK")
</pallas_src>

<mosaic_0001>
module attributes {stable_mosaic.version = 11 : i64} {
  func.func @_policy_kernel(%arg0: i32, %arg1: memref<16x128xf32, #tpu.memory_space<vmem>>, %arg2: memref<144x128xf32, #tpu.memory_space<vmem>>, %arg3: memref<8x128xf32, #tpu.memory_space<vmem>>) attributes {dimension_semantics = [#tpu.dimension_semantics<parallel>], iteration_bounds = array<i64: 1>, scalar_prefetch = 0 : i64, scratch_operands = 0 : i64, tpu.core_type = #tpu.core_type<tc>, window_params = [{transform_indices = @transform_0, window_bounds = array<i64: 16, 128>}, {pipeline_mode = #tpu.pipeline_mode<synchronous>, transform_indices = @transform_1, window_bounds = array<i64: 144, 128>}, {transform_indices = @transform_2, window_bounds = array<i64: 8, 128>}]} {
    %c0 = arith.constant 0 : index
    %c0_0 = arith.constant 0 : index
    %0 = vector.load %arg1[%c0, %c0_0] : memref<16x128xf32, #tpu.memory_space<vmem>>, vector<16x128xf32>
    %c0_1 = arith.constant 0 : index
    %c0_2 = arith.constant 0 : index
    %1 = vector.load %arg2[%c0_1, %c0_2] : memref<144x128xf32, #tpu.memory_space<vmem>>, vector<128x16xf32>
    %c0_3 = arith.constant 0 : index
    %c16 = arith.constant 16 : index
    %2 = vector.load %arg2[%c0_3, %c16] : memref<144x128xf32, #tpu.memory_space<vmem>>, vector<128x1xf32>
    %c0_4 = arith.constant 0 : index
    %c17 = arith.constant 17 : index
    %3 = vector.load %arg2[%c0_4, %c17] : memref<144x128xf32, #tpu.memory_space<vmem>>, vector<8x1xf32>
    %c128 = arith.constant 128 : index
    %c0_5 = arith.constant 0 : index
    %4 = vector.load %arg2[%c128, %c0_5] : memref<144x128xf32, #tpu.memory_space<vmem>>, vector<8x128xf32>
    %cst = arith.constant dense<0.000000e+00> : vector<128x128xf32>
    %5 = tpu.matmul %1, %0, %cst {dimension_numbers = #tpu.dot_dimension_numbers<[1], [0], [0], [1], [0, 0, 1, 1], [], []>} : vector<128x16xf32>, vector<16x128xf32>, vector<128x128xf32> -> vector<128x128xf32>
    %6 = vector.broadcast %2 : vector<128x1xf32> to vector<128x128xf32>
    %7 = arith.addf %5, %6 : vector<128x128xf32>
    %cst_6 = arith.constant 0.000000e+00 : f32
    %8 = vector.broadcast %cst_6 : f32 to vector<128x128xf32>
    %9 = arith.maximumf %7, %8 : vector<128x128xf32>
    %cst_7 = arith.constant dense<0.000000e+00> : vector<8x128xf32>
    %10 = tpu.matmul %4, %9, %cst_7 {dimension_numbers = #tpu.dot_dimension_numbers<[1], [0], [0], [1], [0, 0, 1, 1], [], []>} : vector<8x128xf32>, vector<128x128xf32>, vector<8x128xf32> -> vector<8x128xf32>
    %11 = vector.broadcast %3 : vector<8x1xf32> to vector<8x128xf32>
    %12 = arith.addf %10, %11 : vector<8x128xf32>
    %cst_8 = arith.constant dense<0xFF800000> : vector<128xf32>
    %13 = vector.multi_reduction <maximumf>, %12, %cst_8 [0] : vector<8x128xf32> to vector<128xf32>
    %14 = vector.shape_cast %13 : vector<128xf32> to vector<1x128xf32>
    %15 = vector.broadcast %14 : vector<1x128xf32> to vector<8x128xf32>
    %16 = arith.subf %12, %15 : vector<8x128xf32>
    %17 = math.exp %16 : vector<8x128xf32>
    %cst_9 = arith.constant dense<0.000000e+00> : vector<128xf32>
    %18 = vector.multi_reduction <add>, %17, %cst_9 [0] : vector<8x128xf32> to vector<128xf32>
    %19 = vector.shape_cast %18 : vector<128xf32> to vector<1x128xf32>
    %20 = vector.broadcast %19 : vector<1x128xf32> to vector<8x128xf32>
    %21 = arith.divf %17, %20 : vector<8x128xf32>
    %c0_10 = arith.constant 0 : index
    %c0_11 = arith.constant 0 : index
    %22 = vector.load %arg3[%c0_10, %c0_11] : memref<8x128xf32, #tpu.memory_space<vmem>>, vector<8x128xf32>
    tpu.vector_store %arg3[%c0_10, %c0_11], %21 {strides = array<i32>} : memref<8x128xf32, #tpu.memory_space<vmem>>, vector<8x128xf32>,
    return
  }
  func.func @transform_0(%arg0: i32) -> (i32, i32) {
    %c0_i32 = arith.constant 0 : i32
    %c0_i32_0 = arith.constant 0 : i32
    return %c0_i32, %arg0 : i32, i32
  }
  func.func @transform_1(%arg0: i32) -> (i32, i32) {
    %c0_i32 = arith.constant 0 : i32
    %c0_i32_0 = arith.constant 0 : i32
    %c0_i32_1 = arith.constant 0 : i32
    return %c0_i32, %c0_i32_0 : i32, i32
  }
  func.func @transform_2(%arg0: i32) -> (i32, i32) {
    %c0_i32 = arith.constant 0 : i32
    %c0_i32_0 = arith.constant 0 : i32
    return %c0_i32, %arg0 : i32, i32
  }
}

</mosaic_0001>

<bundles_post_ra>
// kernel: policy_forward.1
= control target key start
LH: loop header
LB: loop body
LE: loop exit
PB: predicated region body
PF: predicated region fallthrough
CT: control target
= control target key end

     0   :  { %vm110_vm0 = vcmask 130048   ;;  %v525_v3 = vmov 16   ;;  %v526_v19 = vmov 0.0   ;;  %vm527_vm1 = vmmov 0   ;;  %s649_s0 = inlined_call_operand.vmem [shape: f32[16,128], index: 0, kind: input, shape index: {}]   ;;  %s650_s1 = inlined_call_operand.vmem [shape: f32[144,128], index: 1, kind: input, shape index: {}]   ;;  %s651_s2 = inlined_call_operand.vmem [shape: f32[8,128], index: 2, kind: output, shape index: {}]  }
   0x1   :  { %v12_v0 = vld [vmem:[%s649_s0 + $0x8] sm:$0xff]  ;;  %v11_v1 = vld [vmem:[%s649_s0] sm:$0xff]  ;;  %518 = vset.pattern.permute.xlu0 %v525_v3  ;;  %519 = vset.pattern.permute.xlu1 %v525_v3  ;;  %v15_v5 = vld [vmem:[%s650_s1 + $0x10] sm:$0xff]  ;;  %v528_v20 = vmov 17  }
   0x2   :  { %v13_v2 = vld [vmem:[%s650_s1] sm:$0xff]  ;;  %451 = vmatprep.subr.mxu0 %v12_v0  ;;  %v14_v4 = vld [vmem:[%s650_s1 + $0x8] sm:$0xff]  ;;  %v28_v6 = vld [vmem:[%s650_s1 + $0x78] sm:$0xff]  ;;  %479 = vmatprep.subr.mxu1 %v526_v19 }
   0x3   :  { %455 = vmatprep.mubr.msk.f32.mxu0 %vm110_vm0, %v13_v2  ;;  %452 = vmatpush3.msra.mxu0 %v12_v0  ;;  %v16_v7 = vld [vmem:[%s650_s1 + $0x18] sm:$0xff]  ;;  %v26_v8 = vld [vmem:[%s650_s1 + $0x68] sm:$0xff]  ;;  %v17_v9 = vld [vmem:[%s650_s1 + $0x20] sm:$0xff] }
   0x4   :  { %453 = vmatprep.subr.mxu0 %v11_v1  ;;  %107 = vperm.xlu0 %518, %v28_v6   ;;  %v27_v10 = vld [vmem:[%s650_s1 + $0x70] sm:$0xff]  ;;  %v18_v11 = vld [vmem:[%s650_s1 + $0x28] sm:$0xff]  ;;  %v25_v12 = vld [vmem:[%s650_s1 + $0x60] sm:$0xff] }
   0x5   :  { %454 = vmatpush3.msra.mxu0 %v11_v1  ;;  %97 = vperm.xlu1 %519, %v26_v8   ;;  %v19_v13 = vld [vmem:[%s650_s1 + $0x30] sm:$0xff]  ;;  %v24_v14 = vld [vmem:[%s650_s1 + $0x58] sm:$0xff]  ;;  %v21_v17 = vld [vmem:[%s650_s1 + $0x40] sm:$0xff] }
   0x6   :  { %456 = vmatmul.mubr.msk.f32.vlgmr.msra.gmra.mxu0 %vm110_vm0, %v14_v4  ;;  %v20_v15 = vld [vmem:[%s650_s1 + $0x38] sm:$0xff]  ;;  %v23_v16 = vld [vmem:[%s650_s1 + $0x50] sm:$0xff]  ;;  %v22_v18 = vld [vmem:[%s650_s1 + $0x48] sm:$0xff]  ;;  %511 = vmatprep.mubr.msk.f32.mxu1 %vm527_vm1, %v526_v19 }
   0x7   :  { %458 = vmatprep.mubr.msk.f32.mxu0 %vm110_vm0, %v15_v5 }
   0x8   :  { %102 = vperm.xlu0 %518, %v27_v10  }
   0x9   :  { %92 = vperm.xlu1 %519, %v25_v12  }
   0xa   :  { %459 = vmatmul.mubr.msk.f32.gmra.mxu0 %vm110_vm0, %v16_v7 }
   0xb   :  { %461 = vmatprep.mubr.msk.f32.mxu0 %vm110_vm0, %v17_v9 }
   0xc   :  { %87 = vperm.xlu0 %518, %v24_v14  }
   0xd   :  { %82 = vperm.xlu1 %519, %v23_v16  }
   0xe   :  { %462 = vmatmul.mubr.msk.f32.gmra.mxu0 %vm110_vm0, %v18_v11 }
   0xf   :  { %464 = vmatprep.mubr.msk.f32.mxu0 %vm110_vm0, %v19_v13 }
  0x10   :  { %77 = vperm.xlu0 %518, %v22_v18  }
  0x11   :  { %72 = vperm.xlu1 %519, %v21_v17  }
  0x12   :  { %465 = vmatmul.mubr.msk.f32.gmra.mxu0 %vm110_vm0, %v20_v15 }
  0x13   :  { %467 = vmatprep.mubr.msk.f32.mxu0 %vm110_vm0, %v21_v17 }
  0x14   :  { %67 = vperm.xlu0 %518, %v20_v15  }
  0x15   :  { %62 = vperm.xlu1 %519, %v19_v13  }
  0x16   :  { %468 = vmatmul.mubr.msk.f32.gmra.mxu0 %vm110_vm0, %v22_v18 }
  0x17   :  { %470 = vmatprep.mubr.msk.f32.mxu0 %vm110_vm0, %v23_v16 }
  0x18   :  { %57 = vperm.xlu0 %518, %v18_v11  }
  0x19   :  { %52 = vperm.xlu1 %519, %v17_v9  }
  0x1a   :  { %471 = vmatmul.mubr.msk.f32.gmra.mxu0 %vm110_vm0, %v24_v14 }
  0x1b   :  { %473 = vmatprep.mubr.msk.f32.mxu0 %vm110_vm0, %v25_v12 }
  0x1c   :  { %47 = vperm.xlu0 %518, %v16_v7  }
  0x1d   :  { %42 = vperm.xlu1 %519, %v15_v5  }
  0x1e   :  { %474 = vmatmul.mubr.msk.f32.gmra.mxu0 %vm110_vm0, %v26_v8 }
  0x1f   :  { %476 = vmatprep.mubr.msk.f32.mxu0 %vm110_vm0, %v27_v10 }
  0x20   :  { %37 = vperm.xlu0 %518, %v14_v4  }
  0x21   :  { %32 = vperm.xlu1 %519, %v13_v2  }
  0x22   :  { %477 = vmatmul.mubr.msk.f32.gmra.mxu0 %vm110_vm0, %v28_v6 }
  0x24   :  { %520 = vset.pattern.permute.xlu0 %v528_v20 }
  0x25   :  { %305 = vperm.xlu0 %520, %v13_v2  }
  0x7f   :  { %v108_v26 = vpop.permute.xlu0 %107 }
  0x80   :  { %v98_v28 = vpop.permute.xlu1 %97 }
  0x83   :  { %v103_v31 = vpop.permute.xlu0 %102 }
  0x84   :  { %v93_v33 = vpop.permute.xlu1 %92 }
  0x87   :  { %v88_v36 = vpop.permute.xlu0 %87 }
  0x88   :  { %v83_v38 = vpop.permute.xlu1 %82 }
  0x8b   :  { %v78_v41 = vpop.permute.xlu0 %77 }
  0x8c   :  { %v73_v44 = vpop.permute.xlu1 %72 }
  0x8f   :  { %v68_v51 = vpop.permute.xlu0 %67 }
  0x90   :  { %v63_v54 = vpop.permute.xlu1 %62 }
  0x93   :  { %v58_v59 = vpop.permute.xlu0 %57 }
  0x94   :  { %v53_v62 = vpop.permute.xlu1 %52 }
  0x97   :  { %v48_v3 = vpop.permute.xlu0 %47 }
  0x98   :  { %v43_v6 = vpop.permute.xlu1 %42 }
  0x9b   :  { %v38_v11 = vpop.permute.xlu0 %37 }
  0x9c   :  { %v33_v14 = vpop.permute.xlu1 %32 }
  0xc6   :  { %v616_v21 = vpop.f32.mrf.mxu0 }
  0xc7   :  { %v215_v15 = vadd.f32 %v616_v21, %v38_v11  ;;  %v29_v21 = vld [vmem:[%s650_s1 + $0x80] sm:$0xff] }
  0xc8   :  { %v618_v22 = vpop.f32.mrf.mxu0 }
  0xc9   :  { %v210_v17 = vadd.f32 %v618_v22, %v33_v14  ;;  %v289_v20 = vmax.f32 %v215_v15, 0.0 }
  0xca   :  { %v620_v23 = vpop.f32.mrf.mxu0 }
  0xcb   :  { %v225_v9 = vadd.f32 %v620_v23, %v48_v3  ;;  %v288_v23 = vmax.f32 %v210_v17, 0.0 }
  0xcc   :  { %v622_v24 = vpop.f32.mrf.mxu0 }
  0xcd   :  { %v220_v12 = vadd.f32 %v622_v24, %v43_v6  ;;  %v291_v16 = vmax.f32 %v225_v9, 0.0  ;;  %v306_v24 = vpop.permute.xlu0 %305 }
  0xce   :  { %v463_v25 = vpop.f32.mrf.mxu0 }
  0xcf   :  { %v235_v4 = vadd.f32 %v463_v25, %v58_v59  ;;  %v290_v18 = vmax.f32 %v220_v12, 0.0 }
  0xd0   :  { %v229_v27 = vpop.f32.mrf.mxu0 }
  0xd1   :  { %v230_v7 = vadd.f32 %v229_v27, %v53_v62  ;;  %v293_v10 = vmax.f32 %v235_v4, 0.0 }
  0xd2   :  { %v466_v29 = vpop.f32.mrf.mxu0 }
  0xd3   :  { %v245_v63 = vadd.f32 %v466_v29, %v68_v51  ;;  %v292_v13 = vmax.f32 %v230_v7, 0.0 }
  0xd4   :  { %v239_v30 = vpop.f32.mrf.mxu0 }
  0xd5   :  { %v240_v1 = vadd.f32 %v239_v30, %v63_v54  ;;  %v295_v5 = vmax.f32 %v245_v63, 0.0 }
  0xd6   :  { %v469_v32 = vpop.f32.mrf.mxu0 }
  0xd7   :  { %v255_v57 = vadd.f32 %v469_v32, %v78_v41  ;;  %v294_v8 = vmax.f32 %v240_v1, 0.0 }
  0xd8   :  { %v249_v34 = vpop.f32.mrf.mxu0 }
  0xd9   :  { %v250_v60 = vadd.f32 %v249_v34, %v73_v44  ;;  %v297_v0 = vmax.f32 %v255_v57, 0.0 }
  0xda   :  { %v472_v35 = vpop.f32.mrf.mxu0 }
  0xdb   :  { %v265_v52 = vadd.f32 %v472_v35, %v88_v36  ;;  %v296_v2 = vmax.f32 %v250_v60, 0.0 }
  0xdc   :  { %v259_v37 = vpop.f32.mrf.mxu0 }
  0xdd   :  { %v260_v55 = vadd.f32 %v259_v37, %v83_v38  ;;  %v299_v58 = vmax.f32 %v265_v52, 0.0 }
  0xde   :  { %v475_v39 = vpop.f32.mrf.mxu0 }
  0xdf   :  { %v275_v46 = vadd.f32 %v475_v39, %v98_v28  ;;  %v298_v61 = vmax.f32 %v260_v55, 0.0 }
  0xe0   :  { %v269_v40 = vpop.f32.mrf.mxu0 }
  0xe1   :  { %v270_v49 = vadd.f32 %v269_v40, %v93_v33  ;;  %v301_v53 = vmax.f32 %v275_v46, 0.0 }
  0xe2   :  { %v478_v42 = vpop.f32.mrf.mxu0 }
  0xe3   :  { %v285_v43 = vadd.f32 %v478_v42, %v108_v26  ;;  %v300_v56 = vmax.f32 %v270_v49, 0.0 }
  0xe4   :  { %v279_v45 = vpop.f32.mrf.mxu0 }
  0xe5   :  { %v303_v47 = vmax.f32 %v285_v43, 0.0  ;;  %v280_v48 = vadd.f32 %v279_v45, %v103_v31 }
  0xe7   :  { %v302_v50 = vmax.f32 %v280_v48, 0.0  ;;  %480 = vmatpush3.msra.mxu1 %v303_v47 }
  0xe8   :  { %481 = vmatprep.subr.mxu1 %v526_v19 }
  0xe9   :  { %482 = vmatpush3.msra.mxu1 %v302_v50 }
  0xea   :  { %483 = vmatprep.subr.mxu1 %v526_v19 }
  0xeb   :  { %484 = vmatpush3.msra.mxu1 %v301_v53 }
  0xec   :  { %485 = vmatprep.subr.mxu1 %v526_v19 }
  0xed   :  { %486 = vmatpush3.msra.mxu1 %v300_v56 }
  0xee   :  { %487 = vmatprep.subr.mxu1 %v526_v19 }
  0xef   :  { %488 = vmatpush3.msra.mxu1 %v299_v58 }
  0xf0   :  { %489 = vmatprep.subr.mxu1 %v526_v19 }
  0xf1   :  { %490 = vmatpush3.msra.mxu1 %v298_v61 }
  0xf2   :  { %491 = vmatprep.subr.mxu1 %v526_v19 }
  0xf3   :  { %492 = vmatpush3.msra.mxu1 %v297_v0 }
  0xf4   :  { %493 = vmatprep.subr.mxu1 %v526_v19 }
  0xf5   :  { %494 = vmatpush3.msra.mxu1 %v296_v2 }
  0xf6   :  { %495 = vmatprep.subr.mxu1 %v526_v19 }
  0xf7   :  { %496 = vmatpush3.msra.mxu1 %v295_v5 }
  0xf8   :  { %497 = vmatprep.subr.mxu1 %v526_v19 }
  0xf9   :  { %498 = vmatpush3.msra.mxu1 %v294_v8 }
  0xfa   :  { %499 = vmatprep.subr.mxu1 %v526_v19 }
  0xfb   :  { %500 = vmatpush3.msra.mxu1 %v293_v10 }
  0xfc   :  { %501 = vmatprep.subr.mxu1 %v526_v19 }
  0xfd   :  { %502 = vmatpush3.msra.mxu1 %v292_v13 }
  0xfe   :  { %503 = vmatprep.subr.mxu1 %v526_v19 }
  0xff   :  { %504 = vmatpush3.msra.mxu1 %v291_v16 }
 0x100   :  { %505 = vmatprep.subr.mxu1 %v526_v19 }
 0x101   :  { %506 = vmatpush3.msra.mxu1 %v290_v18 }
 0x102   :  { %507 = vmatprep.subr.mxu1 %v526_v19 }
 0x103   :  { %508 = vmatpush3.msra.mxu1 %v289_v20 }
 0x104   :  { %509 = vmatprep.subr.mxu1 %v526_v19 }
 0x105   :  { %510 = vmatpush3.msra.mxu1 %v288_v23 }
 0x106   :  { %512 = vmatmul.mubr.f32.vlgmr.msra.gmra.mxu1 %v29_v21 }
 0x1c6   :  { %v374_v22 = vpop.f32.mrf.mxu1 }
 0x1c7   :  { %v375_v25 = vadd.f32 %v374_v22, %v306_v24 }
 0x1c8   :  { %v513_v26 = vpop.f32.mrf.mxu1 }
 0x1c9   :  { %v378_v27 = vrot.slane %v375_v25, 4 }
 0x1cb   :  { %v379_v28 = vmax.f32 %v375_v25, %v378_v27 }
 0x1cd   :  { %v380_v29 = vrot.slane %v379_v28, 2 }
 0x1cf   :  { %v381_v30 = vmax.f32 %v379_v28, %v380_v29 }
 0x1d1   :  { %v382_v31 = vrot.slane %v381_v30, 1 }
 0x1d3   :  { %v383_v32 = vmax.f32 %v381_v30, %v382_v31 }
 0x1d5   :  { %v384_v33 = vsub.f32 %v375_v25, %v383_v32 }
 0x1d7   :  { %v385_v34 = vmul.f32 1.442695, %v384_v33 }
 0x1d9   :  { %521 = vpow2.f32 %v385_v34 }
 0x1e6   :  { %v522_v35 = vpop.eup %521 }
 0x1e7   :  { %v387_v36 = vrot.slane %v522_v35, 4 }
 0x1e9   :  { %v388_v37 = vadd.f32 %v522_v35, %v387_v36 }
 0x1eb   :  { %v389_v38 = vrot.slane %v388_v37, 2 }
 0x1ed   :  { %v390_v19 = vadd.f32 %v389_v38, %v388_v37 }
 0x1ef   :  { %v391_v39 = vrot.slane %v390_v19, 1 }
 0x1f1   :  { %v392_v40 = vadd.f32 %v391_v39, %v390_v19 }
 0x1f3   :  { %523 = vrcp.f32 %v392_v40 }
 0x200   :  { %v524_v41 = vpop.eup %523 }
 0x201   :  { %v394_v42 = vmul.f32 %v524_v41, %v522_v35 }
 0x203   :  { %395 = vst [vmem:[%s651_s2] sm:$0xff] %v394_v42 }

</bundles_post_ra>
